<compile_context>
chip_gen: v7x
topology: tpu7x:2x2x1
jax: 0.10.0
libtpu: 0.0.40
codegen_flags: <defaults>
</compile_context>

<pallas_src>
import functools

import jax
import jax.numpy as jnp
from jax.experimental import pallas as pl
from jax.experimental.pallas import tpu as pltpu

BN_EPS = 1e-5
LANE = 128      # feature / node dims padded to lane width
SUBLANE = 8     # graph-count dim padded to sublane width


def _round_up(x, m):
    return ((x + m - 1) // m) * m


def _pad_axis(x, axis, target):
    pad = target - x.shape[axis]
    if pad <= 0:
        return x
    widths = [(0, 0)] * x.ndim
    widths[axis] = (0, pad)
    return jnp.pad(x, widths)


# --------------------------------------------------------------------------
# Single fused Pallas kernel: conv stack + global_mean_pool + MLP head
# --------------------------------------------------------------------------
def fused_gcn_kernel(a_ref, x_ref, p_ref, *refs, num_convs, num_lins, real_n):
    """Whole GCN forward in one kernel.

    a_ref : (Np, Np)  bf16 normalized adjacency A_hat (zero-padded), DMA'd once
    x_ref : (Np, 1)   bf16 node features (Cin0 == 1, zero-padded rows)
    p_ref : (Gp, Np)  bf16 row-normalized pooling matrix (padded rows/cols = 0)
    refs  : per conv layer (W, gamma, beta), per hidden lin (W, b),
            then (W_out, b_out), then the output ref (Gp, OutPad) f32.
    """
    o_ref = refs[-1]
    prefs = refs[:-1]
    inv_n = 1.0 / float(real_n)          # REAL node count, not padded shape

    a_bf = a_ref[...]                    # (Np, Np) bf16, loaded once, reused per layer

    idx = 0
    h = None
    h_bf = None
    for layer in range(num_convs):
        w_ref, g_ref, bt_ref = prefs[idx:idx + 3]
        idx += 3

        if layer == 0:
            # Cin == 1 reorder: A @ (x * w0) == (A @ x) * w0
            ax = jnp.dot(a_bf, x_ref[...],
                         preferred_element_type=jnp.float32)       # (Np, 1) f32
            h = ax * w_ref[...]                                     # (Np, Cp) f32 (VPU)
        else:
            xw = jnp.dot(h_bf, w_ref[...],
                         preferred_element_type=jnp.float32)        # (Np, Cp) f32
            h = jnp.dot(a_bf, xw.astype(jnp.bfloat16),
                        preferred_element_type=jnp.float32)         # (Np, Cp) f32
        # (conv bias omitted: exactly cancelled by training-mode BN mean subtraction)

        # BatchNorm1d (training batch stats), single pass; padded rows of h are
        # zero here so the sums are exact for the real node count.
        mean = jnp.sum(h, axis=0, keepdims=True) * inv_n
        ex2 = jnp.sum(h * h, axis=0, keepdims=True) * inv_n
        var = jnp.maximum(ex2 - mean * mean, 0.0)                   # clamp for rsqrt
        s = g_ref[...] * jax.lax.rsqrt(var + BN_EPS)
        t = bt_ref[...] - mean * s
        h = jnp.maximum(h * s + t, 0.0)                             # ReLU
        h_bf = h.astype(jnp.bfloat16)   # single cast per layer, reused by next matmuls

    # ---- global_mean_pool as a tiny matmul (pooled tensor stays in vregs) ----
    y = jnp.dot(p_ref[...], h_bf, preferred_element_type=jnp.float32)   # (Gp, Cp) f32

    # ---- MLP head ----
    for _ in range(num_lins):
        w_ref, b_ref = prefs[idx:idx + 2]
        idx += 2
        y = jnp.dot(y.astype(jnp.bfloat16), w_ref[...],
                    preferred_element_type=jnp.float32) + b_ref[...]
        y = jnp.maximum(y, 0.0)

    wout_ref, bout_ref = prefs[idx:idx + 2]
    y = jnp.dot(y.astype(jnp.bfloat16), wout_ref[...],
                preferred_element_type=jnp.float32) + bout_ref[...]
    o_ref[...] = y


# --------------------------------------------------------------------------
# Glue: parameter construction, padding/packing, adjacency & pooling matrices
# --------------------------------------------------------------------------
def init_gcn_params(key, hidden_channels, conv_layers, lin_layers, node_features):
    params = {"convs": [], "bns": [], "lins": [], "lin_out": None}
    in_c = 1
    for _ in range(conv_layers):
        key, kw = jax.random.split(key)
        w = jax.random.normal(kw, (in_c, hidden_channels), jnp.float32) * 0.1
        b = jnp.zeros((hidden_channels,), jnp.float32)   # kept for module parity;
        params["convs"].append((w, b))                    # cancelled by training-mode BN
        params["bns"].append((jnp.ones((hidden_channels,), jnp.float32),
                              jnp.zeros((hidden_channels,), jnp.float32)))
        in_c = hidden_channels
    for _ in range(lin_layers - 1):
        key, kw, kb = jax.random.split(key, 3)
        w = jax.random.normal(kw, (hidden_channels, hidden_channels), jnp.float32) * 0.1
        b = jax.random.normal(kb, (hidden_channels,), jnp.float32) * 0.01
        params["lins"].append((w, b))
    key, kw, kb = jax.random.split(key, 3)
    w = jax.random.normal(kw, (hidden_channels, node_features), jnp.float32) * 0.1
    b = jax.random.normal(kb, (node_features,), jnp.float32) * 0.01
    params["lin_out"] = (w, b)
    return params


def normalized_adjacency(edge_index, num_nodes):
    """A_hat = D^{-1/2} (A + I) D^{-1/2}; self-loops via max() so existing
    self-loops are not double-counted (matches PyG gcn_norm semantics)."""
    src, dst = edge_index
    adj = jnp.zeros((num_nodes, num_nodes), jnp.float32)
    adj = adj.at[src, dst].set(1.0)
    adj = adj.at[dst, src].set(1.0)                       # treat as undirected
    adj = jnp.maximum(adj, jnp.eye(num_nodes, dtype=jnp.float32))
    deg = jnp.sum(adj, axis=1)
    dinv = jax.lax.rsqrt(deg)
    return adj * dinv[:, None] * dinv[None, :]


def build_pool_matrix(batch, g_pad):
    """(G_pad, N) row-normalized one-hot assignment matrix (padded rows = 0)."""
    one_hot = (batch[None, :] == jnp.arange(g_pad)[:, None]).astype(jnp.float32)
    counts = jnp.maximum(jnp.sum(one_hot, axis=1, keepdims=True), 1.0)
    return one_hot / counts


def pack_params(params, hidden_channels, node_features):
    """Zero-pad every feature dim to 128 lanes; store matmul weights in bf16.
    Padded channels stay exactly 0 through conv/BN/ReLU/pool/MLP, so results
    are unchanged after slicing. Conv biases are NOT packed (BN cancels them)."""
    c_pad = _round_up(hidden_channels, LANE)
    out_pad = _round_up(node_features, LANE)
    flat = []
    for li, ((w, _b), (gamma, beta)) in enumerate(zip(params["convs"], params["bns"])):
        if li == 0:
            w_p = _pad_axis(w, 1, c_pad)                       # (1, Cp) f32 (VPU broadcast)
        else:
            w_p = _pad_axis(_pad_axis(w, 1, c_pad), 0, c_pad).astype(jnp.bfloat16)
        flat += [w_p,
                 _pad_axis(gamma.reshape(1, -1), 1, c_pad),
                 _pad_axis(beta.reshape(1, -1), 1, c_pad)]
    for (w, b) in params["lins"]:
        flat += [_pad_axis(_pad_axis(w, 1, c_pad), 0, c_pad).astype(jnp.bfloat16),
                 _pad_axis(b.reshape(1, -1), 1, c_pad)]
    w, b = params["lin_out"]
    flat += [_pad_axis(_pad_axis(w, 1, out_pad), 0, c_pad).astype(jnp.bfloat16),
             _pad_axis(b.reshape(1, -1), 1, out_pad)]
    return flat, c_pad, out_pad


def gcn_forward(params, x, edge_index, batch, num_graphs,
                hidden_channels, node_features):
    n = x.shape[0]
    n_pad = _round_up(n, LANE)            # lane-dense node dim (full MXU columns)
    num_convs = len(params["convs"])
    num_lins = len(params["lins"])

    # A_hat / x / pool built at the REAL node count, then zero-padded.
    a_hat = normalized_adjacency(edge_index, n)
    a_hat = _pad_axis(_pad_axis(a_hat, 0, n_pad), 1, n_pad).astype(jnp.bfloat16)

    g_pad = _round_up(max(num_graphs, 1), SUBLANE)
    pool_mat = _pad_axis(build_pool_matrix(batch, g_pad), 1, n_pad).astype(jnp.bfloat16)

    x_pad = _pad_axis(x, 0, n_pad).astype(jnp.bfloat16)        # (Np, 1)

    flat_params, c_pad, out_pad = pack_params(params, hidden_channels, node_features)
    inputs = [a_hat, x_pad, pool_mat] + flat_params

    # Advisory cost estimate for XLA's scheduler.
    flops = 2 * n_pad * n_pad + 2 * n_pad * c_pad              # layer 0: matvec + broadcast
    flops += num_convs * 8 * n_pad * c_pad                      # BN/ReLU elementwise
    for _ in range(1, num_convs):
        flops += 2 * n_pad * c_pad * c_pad + 2 * n_pad * n_pad * c_pad
    flops += 2 * g_pad * n_pad * c_pad                          # pooling matmul
    flops += num_lins * 2 * g_pad * c_pad * c_pad               # hidden linears
    flops += 2 * g_pad * c_pad * out_pad                        # lin_out
    transcendentals = num_convs * c_pad                         # rsqrt per BN channel
    out_bytes = g_pad * out_pad * 4
    bytes_accessed = sum(int(v.size) * v.dtype.itemsize for v in inputs) + out_bytes

    # VMEM budget: actual footprint + headroom for h scratch / double buffers,
    # capped at 48 MiB so we never request v7x's entire 64 MiB per-TC VMEM.
    h_scratch = 4 * n_pad * c_pad * 4
    vmem_limit = int(min(max(2 * bytes_accessed + h_scratch + (4 << 20), 16 << 20),
                         48 << 20))

    kernel = functools.partial(fused_gcn_kernel,
                               num_convs=num_convs, num_lins=num_lins, real_n=n)

    out = pl.pallas_call(
        kernel,
        out_shape=jax.ShapeDtypeStruct((g_pad, out_pad), jnp.float32),
        in_specs=[pl.BlockSpec(memory_space=pltpu.MemorySpace.VMEM)] * len(inputs),
        out_specs=pl.BlockSpec(memory_space=pltpu.MemorySpace.VMEM),
        compiler_params=pltpu.CompilerParams(vmem_limit_bytes=vmem_limit),
        cost_estimate=pl.CostEstimate(flops=int(flops),
                                      transcendentals=int(transcendentals),
                                      bytes_accessed=int(bytes_accessed)),
    )(*inputs)

    # Slice away the lane / sublane padding.
    return out[:num_graphs, :node_features]
    # TODO(synk): BatchNorm1d running-stat buffers (inference-mode state) are not
    # updated; only the training-mode forward (batch statistics) is implemented.


# --------------------------------------------------------------------------
if __name__ == "__main__":
    hidden_channels = 32
    conv_layers = 2
    lin_layers = 2
    node_features = 4      # output dim of lin_out

    num_nodes = 16
    num_graphs = 2

    key = jax.random.PRNGKey(0)
    key, kx = jax.random.split(key)

    # Node features: GCNConv(1, hidden) -> input is (N, 1)
    x = jax.random.normal(kx, (num_nodes, 1), jnp.float32)

    # Simple deterministic graph: a ring within each of the two 8-node graphs.
    src, dst = [], []
    for g in range(num_graphs):
        base = g * 8
        for i in range(8):
            src.append(base + i)
            dst.append(base + (i + 1) % 8)
    edge_index = jnp.array([src, dst], dtype=jnp.int32)

    # batch assignment: first 8 nodes -> graph 0, next 8 -> graph 1
    batch = jnp.array([0] * 8 + [1] * 8, dtype=jnp.int32)

    params = init_gcn_params(key, hidden_channels, conv_layers,
                             lin_layers, node_features)

    out = gcn_forward(params, x, edge_index, batch, num_graphs,
                      hidden_channels, node_features)
    out = jax.block_until_ready(out)

    assert out.shape == (num_graphs, node_features)
    assert jnp.all(jnp.isfinite(out))
    print("KERNEL_OK")
</pallas_src>

<mosaic_0001>
module attributes {stable_mosaic.version = 11 : i64} {
  func.func @fused_gcn_kernel(%arg0: memref<128x128xbf16, #tpu.memory_space<vmem>>, %arg1: memref<128x1xbf16, #tpu.memory_space<vmem>>, %arg2: memref<8x128xbf16, #tpu.memory_space<vmem>>, %arg3: memref<1x128xf32, #tpu.memory_space<vmem>>, %arg4: memref<1x128xf32, #tpu.memory_space<vmem>>, %arg5: memref<1x128xf32, #tpu.memory_space<vmem>>, %arg6: memref<128x128xbf16, #tpu.memory_space<vmem>>, %arg7: memref<1x128xf32, #tpu.memory_space<vmem>>, %arg8: memref<1x128xf32, #tpu.memory_space<vmem>>, %arg9: memref<128x128xbf16, #tpu.memory_space<vmem>>, %arg10: memref<1x128xf32, #tpu.memory_space<vmem>>, %arg11: memref<128x128xbf16, #tpu.memory_space<vmem>>, %arg12: memref<1x128xf32, #tpu.memory_space<vmem>>, %arg13: memref<8x128xf32, #tpu.memory_space<vmem>>) attributes {dimension_semantics = [], scalar_prefetch = 0 : i64, scratch_operands = 0 : i64, tpu.core_type = #tpu.core_type<tc>} {
    %c0 = arith.constant 0 : index
    %c0_0 = arith.constant 0 : index
    %0 = vector.load %arg0[%c0, %c0_0] : memref<128x128xbf16, #tpu.memory_space<vmem>>, vector<128x128xbf16>
    %c0_1 = arith.constant 0 : index
    %c0_2 = arith.constant 0 : index
    %1 = vector.load %arg1[%c0_1, %c0_2] : memref<128x1xbf16, #tpu.memory_space<vmem>>, vector<128x1xbf16>
    %cst = arith.constant dense<0.000000e+00> : vector<128x1xf32>
    %2 = tpu.matmul %0, %1, %cst {dimension_numbers = #tpu.dot_dimension_numbers<[1], [0], [0], [1], [0, 0, 1, 1], [], []>} : vector<128x128xbf16>, vector<128x1xbf16>, vector<128x1xf32> -> vector<128x1xf32>
    %c0_3 = arith.constant 0 : index
    %c0_4 = arith.constant 0 : index
    %3 = vector.load %arg3[%c0_3, %c0_4] : memref<1x128xf32, #tpu.memory_space<vmem>>, vector<1x128xf32>
    %4 = vector.broadcast %2 : vector<128x1xf32> to vector<128x128xf32>
    %5 = vector.broadcast %3 : vector<1x128xf32> to vector<128x128xf32>
    %6 = arith.mulf %4, %5 : vector<128x128xf32>
    %cst_5 = arith.constant dense<0.000000e+00> : vector<128xf32>
    %7 = vector.multi_reduction <add>, %6, %cst_5 [0] : vector<128x128xf32> to vector<128xf32>
    %8 = vector.shape_cast %7 : vector<128xf32> to vector<1x128xf32>
    %cst_6 = arith.constant 6.250000e-02 : f32
    %9 = vector.broadcast %cst_6 : f32 to vector<1x128xf32>
    %10 = arith.mulf %8, %9 : vector<1x128xf32>
    %11 = arith.mulf %6, %6 : vector<128x128xf32>
    %cst_7 = arith.constant dense<0.000000e+00> : vector<128xf32>
    %12 = vector.multi_reduction <add>, %11, %cst_7 [0] : vector<128x128xf32> to vector<128xf32>
    %13 = vector.shape_cast %12 : vector<128xf32> to vector<1x128xf32>
    %cst_8 = arith.constant 6.250000e-02 : f32
    %14 = vector.broadcast %cst_8 : f32 to vector<1x128xf32>
    %15 = arith.mulf %13, %14 : vector<1x128xf32>
    %16 = arith.mulf %10, %10 : vector<1x128xf32>
    %17 = arith.subf %15, %16 : vector<1x128xf32>
    %cst_9 = arith.constant 0.000000e+00 : f32
    %18 = vector.broadcast %cst_9 : f32 to vector<1x128xf32>
    %19 = arith.maximumf %17, %18 : vector<1x128xf32>
    %c0_10 = arith.constant 0 : index
    %c0_11 = arith.constant 0 : index
    %20 = vector.load %arg4[%c0_10, %c0_11] : memref<1x128xf32, #tpu.memory_space<vmem>>, vector<1x128xf32>
    %cst_12 = arith.constant 9.99999974E-6 : f32
    %21 = vector.broadcast %cst_12 : f32 to vector<1x128xf32>
    %22 = arith.addf %19, %21 : vector<1x128xf32>
    %23 = math.rsqrt %22 : vector<1x128xf32>
    %24 = arith.mulf %20, %23 : vector<1x128xf32>
    %c0_13 = arith.constant 0 : index
    %c0_14 = arith.constant 0 : index
    %25 = vector.load %arg5[%c0_13, %c0_14] : memref<1x128xf32, #tpu.memory_space<vmem>>, vector<1x128xf32>
    %26 = arith.mulf %10, %24 : vector<1x128xf32>
    %27 = arith.subf %25, %26 : vector<1x128xf32>
    %28 = vector.broadcast %24 : vector<1x128xf32> to vector<128x128xf32>
    %29 = arith.mulf %6, %28 : vector<128x128xf32>
    %30 = vector.broadcast %27 : vector<1x128xf32> to vector<128x128xf32>
    %31 = arith.addf %29, %30 : vector<128x128xf32>
    %cst_15 = arith.constant 0.000000e+00 : f32
    %32 = vector.broadcast %cst_15 : f32 to vector<128x128xf32>
    %33 = arith.maximumf %31, %32 : vector<128x128xf32>
    %34 = arith.truncf %33 : vector<128x128xf32> to vector<128x128xbf16>
    %c0_16 = arith.constant 0 : index
    %c0_17 = arith.constant 0 : index
    %35 = vector.load %arg6[%c0_16, %c0_17] : memref<128x128xbf16, #tpu.memory_space<vmem>>, vector<128x128xbf16>
    %cst_18 = arith.constant dense<0.000000e+00> : vector<128x128xf32>
    %36 = tpu.matmul %34, %35, %cst_18 {dimension_numbers = #tpu.dot_dimension_numbers<[1], [0], [0], [1], [0, 0, 1, 1], [], []>} : vector<128x128xbf16>, vector<128x128xbf16>, vector<128x128xf32> -> vector<128x128xf32>
    %37 = arith.truncf %36 : vector<128x128xf32> to vector<128x128xbf16>
    %cst_19 = arith.constant dense<0.000000e+00> : vector<128x128xf32>
    %38 = tpu.matmul %0, %37, %cst_19 {dimension_numbers = #tpu.dot_dimension_numbers<[1], [0], [0], [1], [0, 0, 1, 1], [], []>} : vector<128x128xbf16>, vector<128x128xbf16>, vector<128x128xf32> -> vector<128x128xf32>
    %cst_20 = arith.constant dense<0.000000e+00> : vector<128xf32>
    %39 = vector.multi_reduction <add>, %38, %cst_20 [0] : vector<128x128xf32> to vector<128xf32>
    %40 = vector.shape_cast %39 : vector<128xf32> to vector<1x128xf32>
    %cst_21 = arith.constant 6.250000e-02 : f32
    %41 = vector.broadcast %cst_21 : f32 to vector<1x128xf32>
    %42 = arith.mulf %40, %41 : vector<1x128xf32>
    %43 = arith.mulf %38, %38 : vector<128x128xf32>
    %cst_22 = arith.constant dense<0.000000e+00> : vector<128xf32>
    %44 = vector.multi_reduction <add>, %43, %cst_22 [0] : vector<128x128xf32> to vector<128xf32>
    %45 = vector.shape_cast %44 : vector<128xf32> to vector<1x128xf32>
    %cst_23 = arith.constant 6.250000e-02 : f32
    %46 = vector.broadcast %cst_23 : f32 to vector<1x128xf32>
    %47 = arith.mulf %45, %46 : vector<1x128xf32>
    %48 = arith.mulf %42, %42 : vector<1x128xf32>
    %49 = arith.subf %47, %48 : vector<1x128xf32>
    %cst_24 = arith.constant 0.000000e+00 : f32
    %50 = vector.broadcast %cst_24 : f32 to vector<1x128xf32>
    %51 = arith.maximumf %49, %50 : vector<1x128xf32>
    %c0_25 = arith.constant 0 : index
    %c0_26 = arith.constant 0 : index
    %52 = vector.load %arg7[%c0_25, %c0_26] : memref<1x128xf32, #tpu.memory_space<vmem>>, vector<1x128xf32>
    %cst_27 = arith.constant 9.99999974E-6 : f32
    %53 = vector.broadcast %cst_27 : f32 to vector<1x128xf32>
    %54 = arith.addf %51, %53 : vector<1x128xf32>
    %55 = math.rsqrt %54 : vector<1x128xf32>
    %56 = arith.mulf %52, %55 : vector<1x128xf32>
    %c0_28 = arith.constant 0 : index
    %c0_29 = arith.constant 0 : index
    %57 = vector.load %arg8[%c0_28, %c0_29] : memref<1x128xf32, #tpu.memory_space<vmem>>, vector<1x128xf32>
    %58 = arith.mulf %42, %56 : vector<1x128xf32>
    %59 = arith.subf %57, %58 : vector<1x128xf32>
    %60 = vector.broadcast %56 : vector<1x128xf32> to vector<128x128xf32>
    %61 = arith.mulf %38, %60 : vector<128x128xf32>
    %62 = vector.broadcast %59 : vector<1x128xf32> to vector<128x128xf32>
    %63 = arith.addf %61, %62 : vector<128x128xf32>
    %cst_30 = arith.constant 0.000000e+00 : f32
    %64 = vector.broadcast %cst_30 : f32 to vector<128x128xf32>
    %65 = arith.maximumf %63, %64 : vector<128x128xf32>
    %66 = arith.truncf %65 : vector<128x128xf32> to vector<128x128xbf16>
    %c0_31 = arith.constant 0 : index
    %c0_32 = arith.constant 0 : index
    %67 = vector.load %arg2[%c0_31, %c0_32] : memref<8x128xbf16, #tpu.memory_space<vmem>>, vector<8x128xbf16>
    %cst_33 = arith.constant dense<0.000000e+00> : vector<8x128xf32>
    %68 = tpu.matmul %67, %66, %cst_33 {dimension_numbers = #tpu.dot_dimension_numbers<[1], [0], [0], [1], [0, 0, 1, 1], [], []>} : vector<8x128xbf16>, vector<128x128xbf16>, vector<8x128xf32> -> vector<8x128xf32>
    %69 = arith.truncf %68 : vector<8x128xf32> to vector<8x128xbf16>
    %c0_34 = arith.constant 0 : index
    %c0_35 = arith.constant 0 : index
    %70 = vector.load %arg9[%c0_34, %c0_35] : memref<128x128xbf16, #tpu.memory_space<vmem>>, vector<128x128xbf16>
    %cst_36 = arith.constant dense<0.000000e+00> : vector<8x128xf32>
    %71 = tpu.matmul %69, %70, %cst_36 {dimension_numbers = #tpu.dot_dimension_numbers<[1], [0], [0], [1], [0, 0, 1, 1], [], []>} : vector<8x128xbf16>, vector<128x128xbf16>, vector<8x128xf32> -> vector<8x128xf32>
    %c0_37 = arith.constant 0 : index
    %c0_38 = arith.constant 0 : index
    %72 = vector.load %arg10[%c0_37, %c0_38] : memref<1x128xf32, #tpu.memory_space<vmem>>, vector<1x128xf32>
    %73 = vector.broadcast %72 : vector<1x128xf32> to vector<8x128xf32>
    %74 = arith.addf %71, %73 : vector<8x128xf32>
    %cst_39 = arith.constant 0.000000e+00 : f32
    %75 = vector.broadcast %cst_39 : f32 to vector<8x128xf32>
    %76 = arith.maximumf %74, %75 : vector<8x128xf32>
    %77 = arith.truncf %76 : vector<8x128xf32> to vector<8x128xbf16>
    %c0_40 = arith.constant 0 : index
    %c0_41 = arith.constant 0 : index
    %78 = vector.load %arg11[%c0_40, %c0_41] : memref<128x128xbf16, #tpu.memory_space<vmem>>, vector<128x128xbf16>
    %cst_42 = arith.constant dense<0.000000e+00> : vector<8x128xf32>
    %79 = tpu.matmul %77, %78, %cst_42 {dimension_numbers = #tpu.dot_dimension_numbers<[1], [0], [0], [1], [0, 0, 1, 1], [], []>} : vector<8x128xbf16>, vector<128x128xbf16>, vector<8x128xf32> -> vector<8x128xf32>
    %c0_43 = arith.constant 0 : index
    %c0_44 = arith.constant 0 : index
    %80 = vector.load %arg12[%c0_43, %c0_44] : memref<1x128xf32, #tpu.memory_space<vmem>>, vector<1x128xf32>
    %81 = vector.broadcast %80 : vector<1x128xf32> to vector<8x128xf32>
    %82 = arith.addf %79, %81 : vector<8x128xf32>
    %c0_45 = arith.constant 0 : index
    %c0_46 = arith.constant 0 : index
    %83 = vector.load %arg13[%c0_45, %c0_46] : memref<8x128xf32, #tpu.memory_space<vmem>>, vector<8x128xf32>
    tpu.vector_store %arg13[%c0_45, %c0_46], %82 {strides = array<i32>} : memref<8x128xf32, #tpu.memory_space<vmem>>, vector<8x128xf32>,
    return
  }
}

</mosaic_0001>

<bundles_post_ra>
// kernel: tpu_custom_call.1
= control target key start
LH: loop header
LB: loop body
LE: loop exit
PB: predicated region body
PF: predicated region fallthrough
CT: control target
= control target key end

     0   :  { %18 = vsyncpa [#allocation3], 0  ;;  %s2134_s0 = inlined_call_operand.vmem [shape: bf16[128,128], index: 0, kind: input, shape index: {}]   ;;  %s2135_s1 = inlined_call_operand.vmem [shape: bf16[128,1], index: 1, kind: input, shape index: {}]   ;;  %s2136_s2 = inlined_call_operand.vmem [shape: bf16[8,128], index: 2, kind: input, shape index: {}]   ;;  %s2137_s3 = inlined_call_operand.vmem [shape: f32[1,128], index: 3, kind: input, shape index: {}]   ;;  %s2138_s4 = inlined_call_operand.vmem [shape: f32[1,128], index: 4, kind: input, shape index: {}]   ;;  %s2139_s5 = inlined_call_operand.vmem [shape: f32[1,128], index: 5, kind: input, shape index: {}]   ;;  %s2140_s6 = inlined_call_operand.hbm [shape: bf16[128,128], index: 6, kind: input, shape index: {}]   ;;  %s2141_s7 = inlined_call_operand.vmem [shape: f32[1,128], index: 7, kind: input, shape index: {}]   ;;  %s2142_s8 = inlined_call_operand.vmem [shape: f32[1,128], index: 8, kind: input, shape index: {}]   ;;  %s2143_s9 = inlined_call_operand.hbm [shape: bf16[128,128], index: 9, kind: input, shape index: {}]   ;;  %s2144_s10 = inlined_call_operand.vmem [shape: f32[1,128], index: 10, kind: input, shape index: {}]   ;;  %s2145_s11 = inlined_call_operand.hbm [shape: bf16[128,128], index: 11, kind: input, shape index: {}]   ;;  %s2146_s12 = inlined_call_operand.vmem [shape: f32[1,128], index: 12, kind: input, shape index: {}]   ;;  %s2147_s13 = inlined_call_operand.hbm [shape: f32[8,128], index: 13, kind: output, shape index: {}]  }
   0x1   :  { %19 = vsyncpa [#allocation6], 0 }
   0x2   :  { %20 = vsyncpa [#allocation4], 0  ;;  %s1663_s25 = smov [#allocation5]   ;;  %s1664_s27 = smov [#allocation2]  }
   0x3   :  { %s54_s26 = sshll.u32 %s1663_s25, 4  ;;  %s38_s28 = sshll.u32 %s1664_s27, 4  ;;  %s55_s26 = int_to_ptr.vmem [resolvable:$true] %s54_s26  ;;  %s1742_s28 = int_to_ptr.vmem [resolvable:$true] %s38_s28 }
   0x4   :  { %s1569_s14 = scalar_lea.hbm %s2143_s9, 1024 }
   0x5   :  { %p1570_p0 = scmp.ne.s32.totalorder %s2143_s9, %s1569_s14  ;;  %p1573_p1 = scmp.lt.u32.totalorder %s1569_s14, %s2143_s9 }
   0x7   :  { %p1575_p2 = pnand %p1573_p1, %p1570_p0 }
   0x9   :  { %1578 = shalt.err (!%p1575_p2)
}
   0xa   :  { %s1579_s19 = scalar_lea.vmem %s55_s26, 1024  ;;  %p1584_p4 = scmp.lt.s32.totalorder %s55_s26, %s55_s26 }
   0xb   :  { %p1580_p3 = scmp.ne.s32.totalorder %s55_s26, %s1579_s19  ;;  %p1585_p5 = scmp.lt.s32.totalorder %s1579_s19, %s1579_s19 }
   0xd   :  { %p1586_p6 = por %p1585_p5, %p1584_p4 }
   0xf   :  { %p1587_p7 = pnand %p1586_p6, %p1580_p3 }
  0x11   :  { %1590 = shalt.err (!%p1587_p7)
}
  0x12   :  { %s1665_s20 = smov 64   ;;  %s1666_s21 = smov 4  }
  0x13   :  { %60 = dma.hbm_to_vmem [thread:$0]  %s2143_s9, 1024, %s55_s26, [#allocation6], %s1665_s20, %s1665_s20, %s1666_s21  }
  0x14   :  { %s1591_s27 = scalar_lea.hbm %s2140_s6, 1024 }
  0x15   :  { %p1592_p8 = scmp.ne.s32.totalorder %s2140_s6, %s1591_s27  ;;  %p1595_p9 = scmp.lt.u32.totalorder %s1591_s27, %s2140_s6 }
  0x17   :  { %p1597_p10 = pnand %p1595_p9, %p1592_p8 }
  0x19   :  { %1600 = shalt.err (!%p1597_p10)
}
  0x1a   :  { %s1601_s16 = scalar_lea.vmem %s1742_s28, 1024  ;;  %p1606_p12 = scmp.lt.s32.totalorder %s1742_s28, %s1742_s28 }
  0x1b   :  { %p1602_p11 = scmp.ne.s32.totalorder %s1742_s28, %s1601_s16  ;;  %p1607_p13 = scmp.lt.s32.totalorder %s1601_s16, %s1601_s16 }
  0x1d   :  { %p1608_p0 = por %p1607_p13, %p1606_p12 }
  0x1f   :  { %p1609_p1 = pnand %p1608_p0, %p1602_p11 }
  0x21   :  { %1612 = shalt.err (!%p1609_p1)
}
  0x22   :  { %44 = dma.hbm_to_vmem [thread:$0]  %s2140_s6, 1024, %s1742_s28, [#allocation3], %s1665_s20, %s1665_s20, %s1666_s21  }
  0x23   :  { %s1667_s17 = smov [#allocation7]   ;;  %s1613_s23 = scalar_lea.hbm %s2145_s11, 1024 }
  0x24   :  { %s68_s18 = sshll.u32 %s1667_s17, 4  ;;  %p1614_p2 = scmp.ne.s32.totalorder %s2145_s11, %s1613_s23  ;;  %s69_s18 = int_to_ptr.vmem [resolvable:$true] %s68_s18 }
  0x25   :  { %p1617_p3 = scmp.lt.u32.totalorder %s1613_s23, %s2145_s11 }
  0x27   :  { %p1619_p4 = pnand %p1617_p3, %p1614_p2 }
  0x29   :  { %1622 = shalt.err (!%p1619_p4)
}
  0x2a   :  { %s1623_s30 = scalar_lea.vmem %s69_s18, 1024  ;;  %p1628_p6 = scmp.lt.s32.totalorder %s69_s18, %s69_s18 }
  0x2b   :  { %p1624_p5 = scmp.ne.s32.totalorder %s69_s18, %s1623_s30  ;;  %p1629_p7 = scmp.lt.s32.totalorder %s1623_s30, %s1623_s30 }
  0x2d   :  { %p1630_p8 = por %p1629_p7, %p1628_p6 }
  0x2f   :  { %p1631_p9 = pnand %p1630_p8, %p1624_p5 }
  0x31   :  { %1634 = shalt.err (!%p1631_p9)
}
  0x32   :  { %74 = dma.hbm_to_vmem [thread:$0]  %s2145_s11, 1024, %s69_s18, [#allocation6], %s1665_s20, %s1665_s20, %s1666_s21  }
  0x33   :  { %1657 = dma.done.wait [#allocation3], 1024  }
  0x34   :  { %1658 = vsyncadd [#allocation3], 4294966272 }
  0x35   :  { %1659 = dma.done.wait [#allocation6], 2048  }
  0x36   :  { %1660 = vsyncadd [#allocation6], 4294965248  ;;  %v1668_v0 = vmov 0   ;;  %v1525_v1 = vld [vmem:[%s2135_s1] sm:$0xff]   ;;  %v1526_v2 = vld [vmem:[%s2135_s1 + $0x8] sm:$0xff]   ;;  %vm1670_vm0 = vmmov 0  }
  0x37   :  { %1524 = vset.pattern.permute.xlu1 %v1668_v0  ;;  %1523 = vset.pattern.permute.xlu0 %v1668_v0  ;;  %v1527_v3 = vld [vmem:[%s2135_s1 + $0x10] sm:$0xff]   ;;  %v1528_v4 = vld [vmem:[%s2135_s1 + $0x18] sm:$0xff]   ;;  %v1533_v5 = vld [vmem:[%s2134_s0] sm:$0xff]   ;;  %s1671_s14 = smov [#allocation8]  }
  0x38   :  { %1358 = vmatprep.subr.bf16.mxu0 %v1525_v1  ;;  %1374 = vmatprep.mubr.bf16.mxu0 %v1533_v5  ;;  %v1529_v6 = vld [vmem:[%s2135_s1 + $0x20] sm:$0xff]   ;;  %v1530_v7 = vld [vmem:[%s2135_s1 + $0x28] sm:$0xff]   ;;  %v1531_v8 = vld [vmem:[%s2135_s1 + $0x30] sm:$0xff]   ;;  %s1230_s15 = sshll.u32 %s1671_s14, 4  ;;  %s1231_s15 = int_to_ptr.vmem [resolvable:$true] %s1230_s15 }
  0x39   :  { %1359 = vmatpush3.bf16.msra.mxu0 %v1525_v1  ;;  %v1532_v9 = vld [vmem:[%s2135_s1 + $0x38] sm:$0xff]   ;;  %v1824_v10 = vld [vmem:[%s2134_s0 + $0x8] sm:$0xff]   ;;  %v1829_v11 = vld [vmem:[%s2134_s0 + $0x10] sm:$0xff]   ;;  %p1640_p11 = scmp.lt.s32.totalorder %s1231_s15, %s1231_s15 }
  0x3a   :  { %1360 = vmatprep.subr.bf16.mxu0 %v1526_v2  ;;  %v1836_v12 = vld [vmem:[%s2134_s0 + $0x18] sm:$0xff]   ;;  %v1841_v13 = vld [vmem:[%s2134_s0 + $0x20] sm:$0xff]   ;;  %v1848_v14 = vld [vmem:[%s2134_s0 + $0x28] sm:$0xff]  }
  0x3b   :  { %v1853_v15 = vld [vmem:[%s2134_s0 + $0x30] sm:$0xff]   ;;  %v1860_v16 = vld [vmem:[%s2134_s0 + $0x38] sm:$0xff]   ;;  %v1541_v33 = vld [vmem:[#allocation2] sm:$0xff]  }
  0x3c   :  { %1390 = vmatprep.subr.bf16.mxu1 %v1541_v33  ;;  %v1542_v34 = vld [vmem:[#allocation2 + $0x8] sm:$0xff]   ;;  %v1543_v35 = vld [vmem:[#allocation2 + $0x10] sm:$0xff]   ;;  %v1544_v36 = vld [vmem:[#allocation2 + $0x18] sm:$0xff]  }
  0x3d   :  { %1361 = vmatpush3.bf16.msra.mxu0 %v1526_v2  ;;  %1391 = vmatpush3.bf16.msra.mxu1 %v1541_v33  ;;  %v1545_v37 = vld [vmem:[#allocation2 + $0x20] sm:$0xff]   ;;  %v1546_v38 = vld [vmem:[#allocation2 + $0x28] sm:$0xff]   ;;  %v1547_v39 = vld [vmem:[#allocation2 + $0x30] sm:$0xff]  }
  0x3e   :  { %1362 = vmatprep.subr.bf16.mxu0 %v1527_v3  ;;  %1392 = vmatprep.subr.bf16.mxu1 %v1542_v34  ;;  %v1548_v40 = vld [vmem:[#allocation2 + $0x38] sm:$0xff]   ;;  %v1866_v42 = vld [vmem:[%s2137_s3] ss:$0 sm:$0xff] }
  0x41   :  { %1363 = vmatpush3.bf16.msra.mxu0 %v1527_v3  ;;  %1393 = vmatpush3.bf16.msra.mxu1 %v1542_v34 }
  0x42   :  { %1364 = vmatprep.subr.bf16.mxu0 %v1528_v4  ;;  %1394 = vmatprep.subr.bf16.mxu1 %v1543_v35 }
  0x45   :  { %1365 = vmatpush3.bf16.msra.mxu0 %v1528_v4  ;;  %1395 = vmatpush3.bf16.msra.mxu1 %v1543_v35 }
  0x46   :  { %1366 = vmatprep.subr.bf16.mxu0 %v1529_v6  ;;  %1396 = vmatprep.subr.bf16.mxu1 %v1544_v36 }
  0x49   :  { %1367 = vmatpush3.bf16.msra.mxu0 %v1529_v6  ;;  %1397 = vmatpush3.bf16.msra.mxu1 %v1544_v36 }
  0x4a   :  { %1368 = vmatprep.subr.bf16.mxu0 %v1530_v7  ;;  %1398 = vmatprep.subr.bf16.mxu1 %v1545_v37 }
  0x4d   :  { %1369 = vmatpush3.bf16.msra.mxu0 %v1530_v7  ;;  %1399 = vmatpush3.bf16.msra.mxu1 %v1545_v37 }
  0x4e   :  { %1370 = vmatprep.subr.bf16.mxu0 %v1531_v8  ;;  %1400 = vmatprep.subr.bf16.mxu1 %v1546_v38 }
  0x51   :  { %1371 = vmatpush3.bf16.msra.mxu0 %v1531_v8  ;;  %1401 = vmatpush3.bf16.msra.mxu1 %v1546_v38 }
  0x52   :  { %1372 = vmatprep.subr.bf16.mxu0 %v1532_v9  ;;  %1402 = vmatprep.subr.bf16.mxu1 %v1547_v39 }
  0x55   :  { %1373 = vmatpush3.bf16.msra.mxu0 %v1532_v9  ;;  %1403 = vmatpush3.bf16.msra.mxu1 %v1547_v39 }
  0x56   :  { %1404 = vmatprep.subr.bf16.mxu1 %v1548_v40 }
  0x58   :  { %1375 = vmatmul.mubr.bf16.vlgmr.msra.gmra.mrb[0].mxu0 %v1824_v10 }
  0x59   :  { %1378 = vmatprep.mubr.bf16.mxu0 %v1829_v11  ;;  %1405 = vmatpush3.bf16.msra.mxu1 %v1548_v40 }
  0x60   :  { %1379 = vmatmul.mubr.bf16.gmra.mrb[4].mxu0 %v1836_v12 }
  0x61   :  { %1382 = vmatprep.mubr.bf16.mxu0 %v1841_v13 }
  0x68   :  { %1383 = vmatmul.mubr.bf16.gmra.mrb[8].mxu0 %v1848_v14 }
  0x69   :  { %1386 = vmatprep.mubr.bf16.mxu0 %v1853_v15 }
  0x70   :  { %1387 = vmatmul.mubr.bf16.gmra.mrb[12].mxu0 %v1860_v16 }
  0x71   :  { %1438 = vmatprep.mubr.bf16.mxu0 %v1533_v5 }
 0x12b   :  { %v1376_v17 = vpop.f32.mrb[0].mxu0 }
 0x12c   :  { %325 = vperm.xlu1 %1524, %v1376_v17   ;;  %v249_v18 = vpop.f32.mrb[1].mxu0 }
 0x12d   :  { %315 = vperm.xlu0 %1523, %v249_v18   ;;  %v1377_v19 = vpop.f32.mrb[2].mxu0 }
 0x12e   :  { %v252_v20 = vpop.f32.mrb[3].mxu0 }
 0x130   :  { %330 = vperm.xlu1 %1524, %v1377_v19  }
 0x131   :  { %320 = vperm.xlu0 %1523, %v252_v20  }
 0x133   :  { %v1380_v21 = vpop.f32.mrb[4].mxu0 }
 0x134   :  { %v265_v22 = vpop.f32.mrb[5].mxu0 }
 0x135   :  { %335 = vperm.xlu0 %1523, %v265_v22   ;;  %v1381_v23 = vpop.f32.mrb[6].mxu0 }
 0x136   :  { %v268_v24 = vpop.f32.mrb[7].mxu0 }
 0x137   :  { %340 = vperm.xlu1 %1524, %v268_v24  }
 0x139   :  { %345 = vperm.xlu0 %1523, %v1380_v21  }
 0x13b   :  { %350 = vperm.xlu1 %1524, %v1381_v23   ;;  %v1384_v25 = vpop.f32.mrb[8].mxu0 }
 0x13c   :  { %v281_v26 = vpop.f32.mrb[9].mxu0 }
 0x13d   :  { %355 = vperm.xlu0 %1523, %v281_v26   ;;  %v1385_v27 = vpop.f32.mrb[10].mxu0 }
 0x13e   :  { %v284_v28 = vpop.f32.mrb[11].mxu0 }
 0x13f   :  { %360 = vperm.xlu1 %1524, %v284_v28  }
 0x141   :  { %365 = vperm.xlu0 %1523, %v1384_v25  }
 0x143   :  { %370 = vperm.xlu1 %1524, %v1385_v27   ;;  %v1388_v29 = vpop.f32.mrb[12].mxu0 }
 0x144   :  { %v297_v30 = vpop.f32.mrb[13].mxu0 }
 0x145   :  { %375 = vperm.xlu0 %1523, %v297_v30   ;;  %v1389_v31 = vpop.f32.mrb[14].mxu0 }
 0x146   :  { %v300_v32 = vpop.f32.mrb[15].mxu0 }
 0x147   :  { %380 = vperm.xlu1 %1524, %v300_v32  }
 0x149   :  { %385 = vperm.xlu0 %1523, %v1388_v29  }
 0x14b   :  { %390 = vperm.xlu1 %1524, %v1389_v31  }
 0x1ab   :  { %v326_v41 = vpop.permute.xlu1 %325 }
 0x1ac   :  { %v316_v43 = vpop.permute.xlu0 %315  ;;  %v1872_v47 = vmul.f32 %v1866_v42, %v326_v41 }
 0x1ad   :  { %v1869_v44 = vmul.f32 %v1866_v42, %v316_v43 }
 0x1ae   :  { %v439_v54 = vmul.f32 %v1872_v47, %v1872_v47 }
 0x1af   :  { %v331_v45 = vpop.permute.xlu1 %330  ;;  %v437_v49 = vmul.f32 %v1869_v44, %v1869_v44 }
 0x1b0   :  { %v321_v46 = vpop.permute.xlu0 %320  ;;  %v1880_v50 = vmul.f32 %v1866_v42, %v331_v45 }
 0x1b1   :  { %v1875_v48 = vmul.f32 %v1866_v42, %v321_v46 }
 0x1b2   :  { %v440_v59 = vmul.f32 %v1880_v50, %v1880_v50 }
 0x1b3   :  { %v415_v51 = vadd.f32 %v1875_v48, %v1869_v44  ;;  %v438_v52 = vmul.f32 %v1875_v48, %v1875_v48 }
 0x1b4   :  { %v336_v53 = vpop.permute.xlu0 %335 }
 0x1b5   :  { %v416_v55 = vadd.f32 %v415_v51, %v1872_v47  ;;  %v453_v56 = vadd.f32 %v438_v52, %v437_v49  ;;  %v1890_v57 = vmul.f32 %v1866_v42, %v336_v53 }
 0x1b6   :  { %v341_v58 = vpop.permute.xlu1 %340 }
 0x1b7   :  { %v454_v60 = vadd.f32 %v453_v56, %v439_v54  ;;  %v417_v61 = vadd.f32 %v416_v55, %v1880_v50  ;;  %v1896_v62 = vmul.f32 %v1866_v42, %v341_v58  ;;  %v441_v2 = vmul.f32 %v1890_v57, %v1890_v57 }
 0x1b8   :  { %v346_v63 = vpop.permute.xlu0 %345 }
 0x1b9   :  { %v455_v0 = vadd.f32 %v454_v60, %v440_v59  ;;  %v418_v1 = vadd.f32 %v417_v61, %v1890_v57  ;;  %v1902_v3 = vmul.f32 %v1866_v42, %v346_v63  ;;  %v442_v7 = vmul.f32 %v1896_v62, %v1896_v62 }
 0x1ba   :  { %v351_v4 = vpop.permute.xlu1 %350 }
 0x1bb   :  { %v456_v5 = vadd.f32 %v455_v0, %v441_v2  ;;  %v419_v6 = vadd.f32 %v418_v1, %v1896_v62  ;;  %v1908_v8 = vmul.f32 %v1866_v42, %v351_v4  ;;  %v443_v19 = vmul.f32 %v1902_v3, %v1902_v3 }
 0x1bc   :  { %v356_v9 = vpop.permute.xlu0 %355 }
 0x1bd   :  { %v457_v17 = vadd.f32 %v456_v5, %v442_v7  ;;  %v420_v18 = vadd.f32 %v419_v6, %v1902_v3  ;;  %v1914_v20 = vmul.f32 %v1866_v42, %v356_v9  ;;  %v444_v24 = vmul.f32 %v1908_v8, %v1908_v8 }
 0x1be   :  { %v361_v21 = vpop.permute.xlu1 %360 }
 0x1bf   :  { %v458_v22 = vadd.f32 %v457_v17, %v443_v19  ;;  %v421_v23 = vadd.f32 %v420_v18, %v1908_v8  ;;  %v1920_v25 = vmul.f32 %v1866_v42, %v361_v21  ;;  %v445_v29 = vmul.f32 %v1914_v20, %v1914_v20 }
 0x1c0   :  { %v366_v26 = vpop.permute.xlu0 %365 }
 0x1c1   :  { %v459_v27 = vadd.f32 %v458_v22, %v444_v24  ;;  %v422_v28 = vadd.f32 %v421_v23, %v1914_v20  ;;  %v1926_v30 = vmul.f32 %v1866_v42, %v366_v26  ;;  %v446_v34 = vmul.f32 %v1920_v25, %v1920_v25 }
 0x1c2   :  { %v371_v31 = vpop.permute.xlu1 %370 }
 0x1c3   :  { %v460_v32 = vadd.f32 %v459_v27, %v445_v29  ;;  %v423_v33 = vadd.f32 %v422_v28, %v1920_v25  ;;  %v1932_v35 = vmul.f32 %v1866_v42, %v371_v31  ;;  %v447_v39 = vmul.f32 %v1926_v30, %v1926_v30 }
 0x1c4   :  { %v376_v36 = vpop.permute.xlu0 %375 }
 0x1c5   :  { %v461_v37 = vadd.f32 %v460_v32, %v446_v34  ;;  %v424_v38 = vadd.f32 %v423_v33, %v1926_v30  ;;  %v1938_v40 = vmul.f32 %v1866_v42, %v376_v36  ;;  %v448_v46 = vmul.f32 %v1932_v35, %v1932_v35 }
 0x1c6   :  { %v381_v41 = vpop.permute.xlu1 %380  ;;  %v486_v36 = vlaneseq }
 0x1c7   :  { %v462_v43 = vadd.f32 %v461_v37, %v447_v39  ;;  %v425_v45 = vadd.f32 %v424_v38, %v1932_v35  ;;  %v1944_v49 = vmul.f32 %v1866_v42, %v381_v41  ;;  %v449_v54 = vmul.f32 %v1938_v40, %v1938_v40  ;;  %v478_v38 = vld [vmem:[%s2138_s4] sm:$0x1] }
 0x1c8   :  { %v386_v51 = vpop.permute.xlu0 %385  ;;  %v487_v37 = vshrl.u32 %v486_v36, 7 }
 0x1c9   :  { %v463_v52 = vadd.f32 %v462_v43, %v448_v46  ;;  %v426_v53 = vadd.f32 %v425_v45, %v1938_v40  ;;  %v1950_v55 = vmul.f32 %v1866_v42, %v386_v51  ;;  %v450_v60 = vmul.f32 %v1944_v49, %v1944_v49  ;;  %v482_v45 = vld [vmem:[%s2139_s5] sm:$0x1] }
 0x1ca   :  { %v391_v56 = vpop.permute.xlu1 %390  ;;  %v1962_v39 = vsub.s32 0, %v487_v37 }
 0x1cb   :  { %v464_v58 = vadd.f32 %v463_v52, %v449_v54  ;;  %v427_v59 = vadd.f32 %v426_v53, %v1944_v49  ;;  %v414_v61 = vmul.f32 %v1866_v42, %v391_v56  ;;  %v451_v1 = vmul.f32 %v1950_v55, %v1950_v55 }
 0x1cd   :  { %v465_v63 = vadd.f32 %v464_v58, %v450_v60  ;;  %v428_v0 = vadd.f32 %v427_v59, %v1950_v55  ;;  %v452_v5 = vmul.f32 %v414_v61, %v414_v61 }
 0x1cf   :  { %v466_v2 = vadd.f32 %v465_v63, %v451_v1  ;;  %v429_v4 = vadd.f32 %v428_v0, %v414_v61 }
 0x1d1   :  { %v430_v6 = vrot.slane %v429_v4, 4  ;;  %v467_v7 = vadd.f32 %v466_v2, %v452_v5 }
 0x1d3   :  { %v431_v9 = vadd.f32 %v430_v6, %v429_v4  ;;  %v468_v17 = vrot.slane %v467_v7, 4 }
 0x1d5   :  { %v432_v18 = vrot.slane %v431_v9, 2  ;;  %v469_v19 = vadd.f32 %v468_v17, %v467_v7 }
 0x1d7   :  { %v433_v21 = vadd.f32 %v432_v18, %v431_v9  ;;  %v470_v22 = vrot.slane %v469_v19, 2 }
 0x1d9   :  { %v434_v23 = vrot.slane %v433_v21, 1  ;;  %v471_v24 = vadd.f32 %v470_v22, %v469_v19 }
 0x1db   :  { %v435_v42 = vadd.f32 %v434_v23, %v433_v21  ;;  %v472_v26 = vrot.slane %v471_v24, 1 }
 0x1dd   :  { %v436_v27 = vmul.f32 0.0625, %v435_v42  ;;  %v473_v28 = vadd.f32 %v472_v26, %v471_v24 }
 0x1df   :  { %v474_v29 = vmul.f32 0.0625, %v473_v28  ;;  %v475_v31 = vmul.f32 %v436_v27, %v436_v27 }
 0x1e1   :  { %v476_v32 = vsub.f32 %v474_v29, %v475_v31 }
 0x1e3   :  { %v477_v33 = vmax.f32 %v476_v32, 0.0 }
 0x1e5   :  { %v479_v34 = vadd.f32 1e-05, %v477_v33 }
 0x1e7   :  { %1565 = vrsqrt.f32 %v479_v34 }
 0x1f1   :  { %v1566_v41 = vpop.eup %1565 }
 0x1f2   :  { %v481_v43 = vmul.f32 %v1566_v41, %v478_v38 }
 0x1f4   :  { %v483_v46 = vmul.f32 %v481_v43, %v436_v27  ;;  %v489_v51 = vrot.slane %v481_v43, %v1962_v39 }
 0x1f6   :  { %v484_v52 = vsub.f32 %v482_v45, %v483_v46  ;;  %v506_v53 = vmul.f32 %v489_v51, %v414_v61  ;;  %v491_v54 = vmul.f32 %v489_v51, %v1869_v44  ;;  %v492_v56 = vmul.f32 %v489_v51, %v1875_v48 }
 0x1f7   :  { %v493_v58 = vmul.f32 %v489_v51, %v1872_v47  ;;  %v494_v59 = vmul.f32 %v489_v51, %v1880_v50  ;;  %v495_v60 = vmul.f32 %v489_v51, %v1890_v57  ;;  %v496_v63 = vmul.f32 %v489_v51, %v1896_v62 }
 0x1f8   :  { %v511_v0 = vrot.slane %v484_v52, %v1962_v39  ;;  %v497_v1 = vmul.f32 %v489_v51, %v1902_v3  ;;  %v498_v2 = vmul.f32 %v489_v51, %v1908_v8  ;;  %v499_v61 = vmul.f32 %v489_v51, %v1914_v20 }
 0x1f9   :  { %v500_v44 = vmul.f32 %v489_v51, %v1920_v25  ;;  %v501_v48 = vmul.f32 %v489_v51, %v1926_v30  ;;  %v502_v47 = vmul.f32 %v489_v51, %v1932_v35  ;;  %v503_v50 = vmul.f32 %v489_v51, %v1938_v40 }
 0x1fa   :  { %v513_v4 = vadd.f32 %v511_v0, %v491_v54  ;;  %v514_v57 = vadd.f32 %v511_v0, %v492_v56  ;;  %v515_v5 = vadd.f32 %v511_v0, %v493_v58  ;;  %v516_v62 = vadd.f32 %v511_v0, %v494_v59 }
 0x1fb   :  { %v517_v6 = vadd.f32 %v511_v0, %v495_v60  ;;  %v518_v7 = vadd.f32 %v511_v0, %v496_v63  ;;  %v519_v9 = vadd.f32 %v511_v0, %v497_v1  ;;  %v520_v3 = vadd.f32 %v511_v0, %v498_v2 }
 0x1fc   :  { %v529_v17 = vmax.f32 %v513_v4, 0.0  ;;  %v530_v8 = vmax.f32 %v514_v57, 0.0  ;;  %v531_v18 = vmax.f32 %v515_v5, 0.0  ;;  %v532_v20 = vmax.f32 %v516_v62, 0.0 }
 0x1fd   :  { %v533_v19 = vmax.f32 %v517_v6, 0.0  ;;  %v534_v25 = vmax.f32 %v518_v7, 0.0  ;;  %v535_v21 = vmax.f32 %v519_v9, 0.0  ;;  %v536_v30 = vmax.f32 %v520_v3, 0.0 }
 0x1fe   :  { %v545_v22 = vpack.c.bf16 %v530_v8, %v529_v17  ;;  %v546_v35 = vpack.c.bf16 %v532_v20, %v531_v18  ;;  %v521_v23 = vadd.f32 %v511_v0, %v499_v61  ;;  %v522_v40 = vadd.f32 %v511_v0, %v500_v44 }
 0x1ff   :  { %v547_v24 = vpack.c.bf16 %v534_v25, %v533_v19  ;;  %v548_v42 = vpack.c.bf16 %v536_v30, %v535_v21  ;;  %v523_v26 = vadd.f32 %v511_v0, %v501_v48  ;;  %v524_v27 = vadd.f32 %v511_v0, %v502_v47  ;;  %v1554_v19 = vld [vmem:[#allocation5 + $0x28] sm:$0xff]  }
 0x200   :  { %1406 = vmatprep.mubr.bf16.mxu1 %v545_v22  ;;  %v537_v28 = vmax.f32 %v521_v23, 0.0  ;;  %v538_v29 = vmax.f32 %v522_v40, 0.0  ;;  %v504_v31 = vmul.f32 %v489_v51, %v1944_v49  ;;  %v525_v32 = vadd.f32 %v511_v0, %v503_v50 }
 0x201   :  { %1407 = vmatmul.mubr.bf16.vlgmr.msra.gmra.mrb[0].mxu1 %v546_v35  ;;  %v539_v33 = vmax.f32 %v523_v26, 0.0  ;;  %v540_v34 = vmax.f32 %v524_v27, 0.0  ;;  %v505_v36 = vmul.f32 %v489_v51, %v1950_v55  ;;  %v528_v37 = vadd.f32 %v511_v0, %v506_v53 }
 0x202   :  { %1410 = vmatprep.mubr.bf16.mxu1 %v547_v24  ;;  %v549_v38 = vpack.c.bf16 %v538_v29, %v537_v28  ;;  %v526_v41 = vadd.f32 %v511_v0, %v504_v31  ;;  %v541_v43 = vmax.f32 %v525_v32, 0.0  ;;  %v1669_v18 = vmov 0.0   ;;  %v1555_v24 = vld [vmem:[#allocation5 + $0x30] sm:$0xff]  }
 0x203   :  { %v550_v45 = vpack.c.bf16 %v540_v34, %v539_v33  ;;  %v527_v46 = vadd.f32 %v511_v0, %v505_v36  ;;  %v544_v52 = vmax.f32 %v528_v37, 0.0  ;;  %1454 = vmatprep.subr.bf16.mxu1 %v1669_v18 }
 0x204   :  { %v542_v54 = vmax.f32 %v526_v41, 0.0 }
 0x205   :  { %v543_v56 = vmax.f32 %v527_v46, 0.0 }
 0x206   :  { %v551_v58 = vpack.c.bf16 %v542_v54, %v541_v43 }
 0x207   :  { %v552_v59 = vpack.c.bf16 %v544_v52, %v543_v56 }
 0x209   :  { %1411 = vmatmul.mubr.bf16.gmra.mrb[4].mxu1 %v548_v42 }
 0x20a   :  { %1414 = vmatprep.mubr.bf16.mxu1 %v549_v38 }
 0x211   :  { %1415 = vmatmul.mubr.bf16.gmra.mrb[8].mxu1 %v550_v45 }
 0x212   :  { %1418 = vmatprep.mubr.bf16.mxu1 %v551_v58 }
 0x219   :  { %1419 = vmatmul.mubr.bf16.gmra.mrb[12].mxu1 %v552_v59 }
 0x21a   :  { %1470 = vmatprep.mubr.msk.bf16.mxu1 %vm1670_vm0, %v1669_v18 }
 0x2d4   :  { %v1408_v49 = vpop.f32.mrb[0].mxu1 }
 0x2d5   :  { %v651_v60 = vpop.f32.mrb[1].mxu1 }
 0x2d6   :  { %v1409_v55 = vpop.f32.mrb[2].mxu1 }
 0x2d7   :  { %v715_v51 = vpack.c.bf16 %v1409_v55, %v1408_v49  ;;  %v654_v53 = vpop.f32.mrb[3].mxu1 }
 0x2d8   :  { %v714_v63 = vpack.c.bf16 %v654_v53, %v651_v60 }
 0x2da   :  { %1422 = vmatprep.subr.bf16.mxu0 %v714_v63 }
 0x2db   :  { %1423 = vmatpush3.bf16.msra.mxu0 %v714_v63 }
 0x2dc   :  { %v1412_v1 = vpop.f32.mrb[4].mxu1  ;;  %1424 = vmatprep.subr.bf16.mxu0 %v715_v51 }
 0x2dd   :  { %v667_v0 = vpop.f32.mrb[5].mxu1 }
 0x2de   :  { %v1413_v2 = vpop.f32.mrb[6].mxu1 }
 0x2df   :  { %v717_v61 = vpack.c.bf16 %v1413_v2, %v1412_v1  ;;  %v670_v44 = vpop.f32.mrb[7].mxu1  ;;  %1425 = vmatpush3.bf16.msra.mxu0 %v715_v51 }
 0x2e0   :  { %v716_v48 = vpack.c.bf16 %v670_v44, %v667_v0 }
 0x2e2   :  { %1426 = vmatprep.subr.bf16.mxu0 %v716_v48 }
 0x2e3   :  { %1427 = vmatpush3.bf16.msra.mxu0 %v716_v48 }
 0x2e4   :  { %v1416_v47 = vpop.f32.mrb[8].mxu1  ;;  %1428 = vmatprep.subr.bf16.mxu0 %v717_v61 }
 0x2e5   :  { %v683_v50 = vpop.f32.mrb[9].mxu1 }
 0x2e6   :  { %v1417_v4 = vpop.f32.mrb[10].mxu1 }
 0x2e7   :  { %v719_v57 = vpack.c.bf16 %v1417_v4, %v1416_v47  ;;  %v686_v5 = vpop.f32.mrb[11].mxu1  ;;  %1429 = vmatpush3.bf16.msra.mxu0 %v717_v61 }
 0x2e8   :  { %v718_v62 = vpack.c.bf16 %v686_v5, %v683_v50 }
 0x2ea   :  { %1430 = vmatprep.subr.bf16.mxu0 %v718_v62 }
 0x2eb   :  { %1431 = vmatpush3.bf16.msra.mxu0 %v718_v62 }
 0x2ec   :  { %v1420_v6 = vpop.f32.mrb[12].mxu1  ;;  %1432 = vmatprep.subr.bf16.mxu0 %v719_v57 }
 0x2ed   :  { %v699_v7 = vpop.f32.mrb[13].mxu1 }
 0x2ee   :  { %v1421_v9 = vpop.f32.mrb[14].mxu1 }
 0x2ef   :  { %v721_v3 = vpack.c.bf16 %v1421_v9, %v1420_v6  ;;  %v702_v17 = vpop.f32.mrb[15].mxu1  ;;  %1433 = vmatpush3.bf16.msra.mxu0 %v719_v57 }
 0x2f0   :  { %v720_v8 = vpack.c.bf16 %v702_v17, %v699_v7 }
 0x2f2   :  { %1434 = vmatprep.subr.bf16.mxu0 %v720_v8 }
 0x2f3   :  { %1435 = vmatpush3.bf16.msra.mxu0 %v720_v8 }
 0x2f4   :  { %1436 = vmatprep.subr.bf16.mxu0 %v721_v3 }
 0x2f7   :  { %1437 = vmatpush3.bf16.msra.mxu0 %v721_v3 }
 0x2f8   :  { %1474 = vmatprep.subr.bf16.mxu0 %v1669_v18 }
 0x2fa   :  { %1439 = vmatmul.mubr.bf16.vlgmr.msra.gmra.mrb[16].mxu0 %v1824_v10  ;;  %v1549_v10 = vld [vmem:[#allocation5] sm:$0xff]  }
 0x2fb   :  { %1442 = vmatprep.mubr.bf16.mxu0 %v1829_v11  ;;  %1475 = vmatpush3.bf16.msra.mxu0 %v1549_v10  ;;  %v1550_v11 = vld [vmem:[#allocation5 + $0x8] sm:$0xff]  }
 0x2fc   :  { %1476 = vmatprep.subr.bf16.mxu0 %v1669_v18 }
 0x2ff   :  { %1477 = vmatpush3.bf16.msra.mxu0 %v1550_v11 }
 0x300   :  { %1478 = vmatprep.subr.bf16.mxu0 %v1669_v18 }
 0x302   :  { %1443 = vmatmul.mubr.bf16.gmra.mrb[20].mxu0 %v1836_v12  ;;  %v1551_v12 = vld [vmem:[#allocation5 + $0x10] sm:$0xff]  }
 0x303   :  { %1446 = vmatprep.mubr.bf16.mxu0 %v1841_v13  ;;  %1479 = vmatpush3.bf16.msra.mxu0 %v1551_v12  ;;  %v1552_v13 = vld [vmem:[#allocation5 + $0x18] sm:$0xff]  }
 0x304   :  { %1480 = vmatprep.subr.bf16.mxu0 %v1669_v18 }
 0x307   :  { %1481 = vmatpush3.bf16.msra.mxu0 %v1552_v13 }
 0x308   :  { %1482 = vmatprep.subr.bf16.mxu0 %v1669_v18 }
 0x30a   :  { %1447 = vmatmul.mubr.bf16.gmra.mrb[24].mxu0 %v1848_v14  ;;  %v1553_v14 = vld [vmem:[#allocation5 + $0x20] sm:$0xff]  }
 0x30b   :  { %1450 = vmatprep.mubr.bf16.mxu0 %v1853_v15  ;;  %1483 = vmatpush3.bf16.msra.mxu0 %v1553_v14 }
 0x30c   :  { %1484 = vmatprep.subr.bf16.mxu0 %v1669_v18 }
 0x30f   :  { %1485 = vmatpush3.bf16.msra.mxu0 %v1554_v19 }
 0x310   :  { %1486 = vmatprep.subr.bf16.mxu0 %v1669_v18 }
 0x312   :  { %1451 = vmatmul.mubr.bf16.gmra.mrb[28].mxu0 %v1860_v16 }
 0x313   :  { %1490 = vmatprep.mubr.msk.bf16.mxu0 %vm1670_vm0, %v1669_v18  ;;  %1487 = vmatpush3.bf16.msra.mxu0 %v1555_v24 }
 0x314   :  { %1488 = vmatprep.subr.bf16.mxu0 %v1669_v18 }
 0x3cd   :  { %v2001_v15 = vpop.f32.mrb[16].mxu0 }
 0x3ce   :  { %v2003_v16 = vpop.f32.mrb[17].mxu0  ;;  %v843_v35 = vmul.f32 %v2001_v15, %v2001_v15 }
 0x3cf   :  { %v2005_v20 = vpop.f32.mrb[18].mxu0  ;;  %v841_v21 = vmul.f32 %v2003_v16, %v2003_v16 }
 0x3d0   :  { %v2007_v25 = vpop.f32.mrb[19].mxu0  ;;  %v844_v42 = vmul.f32 %v2005_v20, %v2005_v20 }
 0x3d1   :  { %v819_v30 = vadd.f32 %v2007_v25, %v2003_v16  ;;  %v842_v22 = vmul.f32 %v2007_v25, %v2007_v25 }
 0x3d3   :  { %v820_v23 = vadd.f32 %v2001_v15, %v819_v30  ;;  %v857_v40 = vadd.f32 %v842_v22, %v841_v21 }
 0x3d5   :  { %v858_v26 = vadd.f32 %v857_v40, %v843_v35  ;;  %v2022_v27 = vpop.f32.mrb[20].mxu0  ;;  %v821_v28 = vadd.f32 %v2005_v20, %v820_v23 }
 0x3d6   :  { %v2025_v29 = vpop.f32.mrb[21].mxu0  ;;  %v847_v43 = vmul.f32 %v2022_v27, %v2022_v27 }
 0x3d7   :  { %v822_v31 = vadd.f32 %v821_v28, %v2025_v29  ;;  %v845_v32 = vmul.f32 %v2025_v29, %v2025_v29  ;;  %v859_v33 = vadd.f32 %v858_v26, %v844_v42  ;;  %v2030_v34 = vpop.f32.mrb[22].mxu0 }
 0x3d8   :  { %v2032_v36 = vpop.f32.mrb[23].mxu0  ;;  %v848_v52 = vmul.f32 %v2030_v34, %v2030_v34 }
 0x3d9   :  { %v860_v37 = vadd.f32 %v859_v33, %v845_v32  ;;  %v823_v38 = vadd.f32 %v822_v31, %v2032_v36  ;;  %v846_v41 = vmul.f32 %v2032_v36, %v2032_v36 }
 0x3db   :  { %v824_v45 = vadd.f32 %v2022_v27, %v823_v38  ;;  %v861_v46 = vadd.f32 %v860_v37, %v846_v41 }
 0x3dd   :  { %v862_v54 = vadd.f32 %v861_v46, %v847_v43  ;;  %v2043_v56 = vpop.f32.mrb[24].mxu0  ;;  %v825_v58 = vadd.f32 %v2030_v34, %v824_v45 }
 0x3de   :  { %v2046_v59 = vpop.f32.mrb[25].mxu0  ;;  %v851_v2 = vmul.f32 %v2043_v56, %v2043_v56 }
 0x3df   :  { %v826_v49 = vadd.f32 %v825_v58, %v2046_v59  ;;  %v849_v60 = vmul.f32 %v2046_v59, %v2046_v59  ;;  %v863_v55 = vadd.f32 %v862_v54, %v848_v52  ;;  %v2051_v51 = vpop.f32.mrb[26].mxu0  ;;  %v882_v52 = vld [vmem:[%s2141_s7] sm:$0x1] }
 0x3e0   :  { %v2053_v53 = vpop.f32.mrb[27].mxu0  ;;  %v852_v48 = vmul.f32 %v2051_v51, %v2051_v51 }
 0x3e1   :  { %v864_v63 = vadd.f32 %v863_v55, %v849_v60  ;;  %v827_v1 = vadd.f32 %v826_v49, %v2053_v53  ;;  %v850_v0 = vmul.f32 %v2053_v53, %v2053_v53  ;;  %v886_v49 = vld [vmem:[%s2142_s8] sm:$0x1] }
 0x3e3   :  { %v828_v61 = vadd.f32 %v2043_v56, %v827_v1  ;;  %v865_v44 = vadd.f32 %v864_v63, %v850_v0 }
 0x3e5   :  { %v866_v47 = vadd.f32 %v865_v44, %v851_v2  ;;  %v2063_v50 = vpop.f32.mrb[28].mxu0  ;;  %v829_v4 = vadd.f32 %v2051_v51, %v828_v61 }
 0x3e6   :  { %v804_v57 = vpop.f32.mrb[29].mxu0  ;;  %v855_v10 = vmul.f32 %v2063_v50, %v2063_v50 }
 0x3e7   :  { %v830_v5 = vadd.f32 %v829_v4, %v804_v57  ;;  %v853_v62 = vmul.f32 %v804_v57, %v804_v57  ;;  %v867_v6 = vadd.f32 %v866_v47, %v852_v48  ;;  %v2066_v7 = vpop.f32.mrb[30].mxu0 }
 0x3e8   :  { %v807_v9 = vpop.f32.mrb[31].mxu0  ;;  %v856_v13 = vmul.f32 %v2066_v7, %v2066_v7 }
 0x3e9   :  { %v868_v3 = vadd.f32 %v867_v6, %v853_v62  ;;  %v831_v17 = vadd.f32 %v830_v5, %v807_v9  ;;  %v854_v8 = vmul.f32 %v807_v9, %v807_v9 }
 0x3eb   :  { %v832_v11 = vadd.f32 %v2063_v50, %v831_v17  ;;  %v869_v12 = vadd.f32 %v868_v3, %v854_v8 }
 0x3ed   :  { %v833_v14 = vadd.f32 %v2066_v7, %v832_v11  ;;  %v870_v19 = vadd.f32 %v869_v12, %v855_v10 }
 0x3ef   :  { %v834_v21 = vrot.slane %v833_v14, 4  ;;  %v871_v30 = vadd.f32 %v870_v19, %v856_v13 }
 0x3f1   :  { %v835_v22 = vadd.f32 %v834_v21, %v833_v14  ;;  %v872_v35 = vrot.slane %v871_v30, 4 }
 0x3f3   :  { %v836_v23 = vrot.slane %v835_v22, 2  ;;  %v873_v40 = vadd.f32 %v872_v35, %v871_v30 }
 0x3f5   :  { %v837_v24 = vadd.f32 %v836_v23, %v835_v22  ;;  %v874_v42 = vrot.slane %v873_v40, 2 }
 0x3f7   :  { %v838_v26 = vrot.slane %v837_v24, 1  ;;  %v875_v28 = vadd.f32 %v874_v42, %v873_v40 }
 0x3f9   :  { %v839_v31 = vadd.f32 %v838_v26, %v837_v24  ;;  %v876_v32 = vrot.slane %v875_v28, 1 }
 0x3fb   :  { %v840_v33 = vmul.f32 0.0625, %v839_v31  ;;  %v877_v37 = vadd.f32 %v876_v32, %v875_v28 }
 0x3fd   :  { %v878_v38 = vmul.f32 0.0625, %v877_v37  ;;  %v879_v41 = vmul.f32 %v840_v33, %v840_v33 }
 0x3ff   :  { %v880_v43 = vsub.f32 %v878_v38, %v879_v41 }
 0x401   :  { %v881_v45 = vmax.f32 %v880_v43, 0.0 }
 0x403   :  { %v883_v46 = vadd.f32 1e-05, %v881_v45 }
 0x405   :  { %1567 = vrsqrt.f32 %v883_v46 }
 0x40f   :  { %v1568_v54 = vpop.eup %1567 }
 0x410   :  { %v885_v58 = vmul.f32 %v1568_v54, %v882_v52 }
 0x412   :  { %v887_v60 = vmul.f32 %v885_v58, %v840_v33  ;;  %v893_v55 = vrot.slane %v885_v58, %v1962_v39 }
 0x414   :  { %v888_v63 = vsub.f32 %v886_v49, %v887_v60  ;;  %v908_v1 = vmul.f32 %v893_v55, %v807_v9  ;;  %v895_v0 = vmul.f32 %v893_v55, %v2003_v16  ;;  %v896_v2 = vmul.f32 %v893_v55, %v2007_v25  ;;  %v1557_v49 = vld [vmem:[#allocation7] sm:$0xff]   ;;  %v1558_v60 = vld [vmem:[#allocation7 + $0x8] sm:$0xff]  }
 0x415   :  { %v897_v61 = vmul.f32 %v2001_v15, %v893_v55  ;;  %v898_v44 = vmul.f32 %v2005_v20, %v893_v55  ;;  %v899_v48 = vmul.f32 %v893_v55, %v2025_v29  ;;  %v900_v47 = vmul.f32 %v893_v55, %v2032_v36 }
 0x416   :  { %v915_v4 = vrot.slane %v888_v63, %v1962_v39  ;;  %v901_v5 = vmul.f32 %v2022_v27, %v893_v55  ;;  %v902_v62 = vmul.f32 %v2030_v34, %v893_v55  ;;  %v903_v6 = vmul.f32 %v893_v55, %v2046_v59  ;;  %v1560_v63 = vld [vmem:[#allocation7 + $0x18] sm:$0xff]  }
 0x417   :  { %v904_v16 = vmul.f32 %v893_v55, %v2053_v53  ;;  %v905_v25 = vmul.f32 %v2043_v56, %v893_v55  ;;  %v906_v15 = vmul.f32 %v2051_v51, %v893_v55  ;;  %v907_v9 = vmul.f32 %v893_v55, %v804_v57 }
 0x418   :  { %v930_v20 = vadd.f32 %v915_v4, %v908_v1  ;;  %v917_v3 = vadd.f32 %v915_v4, %v895_v0  ;;  %v918_v29 = vadd.f32 %v915_v4, %v896_v2  ;;  %v919_v17 = vadd.f32 %v915_v4, %v897_v61  ;;  %v1561_v1 = vld [vmem:[#allocation7 + $0x20] sm:$0xff]   ;;  %v1562_v0 = vld [vmem:[#allocation7 + $0x28] sm:$0xff]  }
 0x419   :  { %v920_v36 = vadd.f32 %v915_v4, %v898_v44  ;;  %v921_v8 = vadd.f32 %v915_v4, %v899_v48  ;;  %v922_v39 = vadd.f32 %v915_v4, %v900_v47  ;;  %v923_v10 = vadd.f32 %v915_v4, %v901_v5  ;;  %v1564_v5 = vld [vmem:[#allocation7 + $0x38] sm:$0xff]  }
 0x41a   :  { %v946_v27 = vmax.f32 %v930_v20, 0.0  ;;  %v933_v11 = vmax.f32 %v917_v3, 0.0  ;;  %v934_v34 = vmax.f32 %v918_v29, 0.0  ;;  %v935_v12 = vmax.f32 %v919_v17, 0.0  ;;  %v1274_v29 = vld [vmem:[%s2146_s12] ss:$0 sm:$0xff] }
 0x41b   :  { %v936_v59 = vmax.f32 %v920_v36, 0.0  ;;  %v937_v13 = vmax.f32 %v921_v8, 0.0  ;;  %v938_v53 = vmax.f32 %v922_v39, 0.0  ;;  %v924_v14 = vadd.f32 %v915_v4, %v902_v62  ;;  %v1265_v62 = vld [vmem:[%s2144_s10] ss:$0 sm:$0xff]  ;;  %s1635_s10 = scalar_lea.vmem %s1231_s15, 128 }
 0x41c   :  { %v949_v56 = vpack.c.bf16 %v934_v34, %v933_v11  ;;  %v939_v19 = vmax.f32 %v923_v10, 0.0  ;;  %v925_v51 = vadd.f32 %v915_v4, %v903_v6  ;;  %v926_v57 = vadd.f32 %v915_v4, %v904_v16  ;;  %p1636_p10 = scmp.ne.s32.totalorder %s1231_s15, %s1635_s10  ;;  %p1641_p12 = scmp.lt.s32.totalorder %s1635_s10, %s1635_s10 }
 0x41d   :  { %v950_v21 = vpack.c.bf16 %v936_v59, %v935_v12  ;;  %v951_v30 = vpack.c.bf16 %v938_v53, %v937_v13  ;;  %v940_v22 = vmax.f32 %v924_v14, 0.0  ;;  %v927_v35 = vadd.f32 %v915_v4, %v905_v25 }
 0x41e   :  { %1455 = vmatpush3.bf16.msra.mxu1 %v949_v56  ;;  %v941_v23 = vmax.f32 %v925_v51, 0.0  ;;  %v942_v40 = vmax.f32 %v926_v57, 0.0  ;;  %v928_v24 = vadd.f32 %v915_v4, %v906_v15  ;;  %v929_v42 = vadd.f32 %v915_v4, %v907_v9  ;;  %p1642_p13 = por %p1641_p12, %p1640_p11 }
 0x41f   :  { %1456 = vmatprep.subr.bf16.mxu1 %v1669_v18  ;;  %v952_v26 = vpack.c.bf16 %v940_v22, %v939_v19  ;;  %v943_v28 = vmax.f32 %v927_v35, 0.0  ;;  %v909_v31 = vmul.f32 %v2063_v50, %v893_v55  ;;  %v910_v32 = vmul.f32 %v2066_v7, %v893_v55  ;;  %v957_v50 = vld [vmem:[%s2136_s2] sm:$0xf]  ;;  %v1556_v7 = vld [vmem:[#allocation5 + $0x38] sm:$0xff]   ;;  %v1559_v55 = vld [vmem:[#allocation7 + $0x10] sm:$0xff]  }
 0x420   :  { %v953_v33 = vpack.c.bf16 %v942_v40, %v941_v23  ;;  %v944_v37 = vmax.f32 %v928_v24, 0.0  ;;  %v945_v38 = vmax.f32 %v929_v42, 0.0  ;;  %1489 = vmatpush3.bf16.msra.mxu0 %v1556_v7  ;;  %p1643_p0 = pnand %p1642_p13, %p1636_p10 }
 0x421   :  { %v931_v41 = vadd.f32 %v915_v4, %v909_v31  ;;  %v932_v43 = vadd.f32 %v915_v4, %v910_v32  ;;  %v1563_v4 = vld [vmem:[#allocation7 + $0x30] sm:$0xff]  }
 0x422   :  { %1457 = vmatpush3.bf16.msra.mxu1 %v950_v21  ;;  %v954_v45 = vpack.c.bf16 %v944_v37, %v943_v28  ;;  %v955_v46 = vpack.c.bf16 %v946_v27, %v945_v38 }
 0x423   :  { %1458 = vmatprep.subr.bf16.mxu1 %v1669_v18  ;;  %v947_v52 = vmax.f32 %v931_v41, 0.0  ;;  %v948_v54 = vmax.f32 %v932_v43, 0.0 }
 0x425   :  { %v956_v58 = vpack.c.bf16 %v948_v54, %v947_v52 }
 0x426   :  { %1459 = vmatpush3.bf16.msra.mxu1 %v951_v30 }
 0x427   :  { %1460 = vmatprep.subr.bf16.mxu1 %v1669_v18 }
 0x42a   :  { %1461 = vmatpush3.bf16.msra.mxu1 %v952_v26 }
 0x42b   :  { %1462 = vmatprep.subr.bf16.mxu1 %v1669_v18 }
 0x42e   :  { %1463 = vmatpush3.bf16.msra.mxu1 %v953_v33 }
 0x42f   :  { %1464 = vmatprep.subr.bf16.mxu1 %v1669_v18 }
 0x432   :  { %1465 = vmatpush3.bf16.msra.mxu1 %v954_v45 }
 0x433   :  { %1466 = vmatprep.subr.bf16.mxu1 %v1669_v18 }
 0x436   :  { %1467 = vmatpush3.bf16.msra.mxu1 %v955_v46 }
 0x437   :  { %1468 = vmatprep.subr.bf16.mxu1 %v1669_v18 }
 0x43a   :  { %1469 = vmatpush3.bf16.msra.mxu1 %v956_v58 }
 0x43b   :  { %1494 = vmatprep.subr.bf16.mxu1 %v1669_v18 }
 0x43d   :  { %1471 = vmatmul.mubr.bf16.vlgmr.msra.gmra.mrb[16].mxu1 %v957_v50 }
 0x43e   :  { %1510 = vmatprep.mubr.msk.bf16.mxu1 %vm1670_vm0, %v1669_v18  ;;  %1495 = vmatpush3.bf16.msra.mxu1 %v1557_v49 }
 0x43f   :  { %1496 = vmatprep.subr.bf16.mxu1 %v1669_v18 }
 0x442   :  { %1497 = vmatpush3.bf16.msra.mxu1 %v1558_v60 }
 0x443   :  { %1498 = vmatprep.subr.bf16.mxu1 %v1669_v18 }
 0x446   :  { %1499 = vmatpush3.bf16.msra.mxu1 %v1559_v55 }
 0x447   :  { %1500 = vmatprep.subr.bf16.mxu1 %v1669_v18 }
 0x44a   :  { %1501 = vmatpush3.bf16.msra.mxu1 %v1560_v63 }
 0x44b   :  { %1502 = vmatprep.subr.bf16.mxu1 %v1669_v18 }
 0x44e   :  { %1503 = vmatpush3.bf16.msra.mxu1 %v1561_v1 }
 0x44f   :  { %1504 = vmatprep.subr.bf16.mxu1 %v1669_v18 }
 0x452   :  { %1505 = vmatpush3.bf16.msra.mxu1 %v1562_v0 }
 0x453   :  { %1506 = vmatprep.subr.bf16.mxu1 %v1669_v18 }
 0x456   :  { %1507 = vmatpush3.bf16.msra.mxu1 %v1563_v4 }
 0x457   :  { %1508 = vmatprep.subr.bf16.mxu1 %v1669_v18 }
 0x45a   :  { %1509 = vmatpush3.bf16.msra.mxu1 %v1564_v5 }
 0x510   :  { %v992_v2 = vpop.f32.mrb[16].mxu1 }
 0x511   :  { %v998_v61 = vpack.c.bf16 %v992_v2, %v992_v2  ;;  %v1472_v44 = vpop.f32.mrb[17].mxu1 }
 0x512   :  { %v995_v48 = vpop.f32.mrb[18].mxu1 }
 0x513   :  { %v1473_v47 = vpop.f32.mrb[19].mxu1  ;;  %1491 = vmatmul.mubr.bf16.vlgmr.msra.gmra.mrb[32].mxu0 %v998_v61 }
 0x5e6   :  { %v1104_v6 = vpop.f32.mrb[32].mxu0 }
 0x5e7   :  { %v1105_v16 = vadd.f32 %v1265_v62, %v1104_v6  ;;  %v1492_v25 = vpop.f32.mrb[33].mxu0 }
 0x5e8   :  { %v1107_v15 = vpop.f32.mrb[34].mxu0 }
 0x5e9   :  { %v1110_v9 = vmax.f32 %v1105_v16, 0.0  ;;  %v1493_v20 = vpop.f32.mrb[35].mxu0 }
 0x5eb   :  { %v1111_v3 = vpack.c.bf16 %v1110_v9, %v1110_v9 }
 0x5ed   :  { %1511 = vmatmul.mubr.bf16.vlgmr.msra.gmra.mrb[20].mxu1 %v1111_v3 }
 0x6c0   :  { %v1217_v18 = vpop.f32.mrb[20].mxu1 }
 0x6c1   :  { %v1218_v17 = vadd.f32 %v1274_v29, %v1217_v18  ;;  %v1512_v36 = vpop.f32.mrb[21].mxu1 }
 0x6c2   :  { %v1220_v8 = vpop.f32.mrb[22].mxu1 }
 0x6c3   :  { %1223 = vst [vmem:[#allocation8] sm:$0xff] %v1218_v17  ;;  %v1513_v39 = vpop.f32.mrb[23].mxu1 }
 0x6c4   :  { %1646 = shalt.err (!%p1643_p0)
}
 0x6c5   :  { %s1647_s12 = scalar_lea.hbm %s2147_s13, 128 }
 0x6c6   :  { %p1648_p1 = scmp.ne.s32.totalorder %s2147_s13, %s1647_s12  ;;  %p1651_p2 = scmp.lt.u32.totalorder %s1647_s12, %s2147_s13 }
 0x6c8   :  { %p1653_p3 = pnand %p1651_p2, %p1648_p1 }
 0x6ca   :  { %1656 = shalt.err (!%p1653_p3)
}
 0x6cb   :  { %1233 = dma.vmem_to_hbm [thread:$0]  %s1231_s15, 128, %s2147_s13, [#allocation4]  }
 0x6cc   :  { %1661 = dma.done.wait [#allocation4], 128  }
 0x6cd   :  { %1662 = vsyncadd [#allocation4], 4294967168 }
 0x6ce   :  { %1237 = vsyncpa [#allocation3], 1 }
 0x6cf   :  { %1238 = vsyncpa [#allocation6], 1 }
 0x6d0   :  { %1239 = vsyncpa [#allocation4], 1 }

</bundles_post_ra>
